<compile_context>
chip_gen: v7x
topology: tpu7x:2x2x1
jax: 0.10.0
libtpu: 0.0.40
codegen_flags: <defaults>
</compile_context>

<pallas_src>
import math

import jax
import jax.numpy as jnp
from jax.experimental import pallas as pl
from jax.experimental.pallas import tpu as pltpu

D = 15          # input feature dim (matches the PyTorch module)
H1, H2, OUT = 64, 32, 10


def _round_up(n, m):
    return ((n + m - 1) // m) * m


def _mlp_kernel(x_ref, w1_ref, b1_ref, w2_ref, b2_ref, w3_ref, b3_ref, o_ref):
    # x tile: [TB, D] bf16.  Weights bf16, biases f32.  All matmuls accumulate in f32 on the MXU.
    x = x_ref[...]

    # Linear(15 -> 64) + ReLU
    h1 = jnp.dot(x, w1_ref[...], preferred_element_type=jnp.float32) + b1_ref[...]
    h1 = jnp.maximum(h1, 0.0)

    # Linear(64 -> 32) + ReLU
    h2 = jnp.dot(h1.astype(jnp.bfloat16), w2_ref[...],
                 preferred_element_type=jnp.float32) + b2_ref[...]
    h2 = jnp.maximum(h2, 0.0)

    # Linear(32 -> 10) + Sigmoid (exp + reciprocal on the EUP)
    z = jnp.dot(h2.astype(jnp.bfloat16), w3_ref[...],
                preferred_element_type=jnp.float32) + b3_ref[...]
    o_ref[...] = jax.nn.sigmoid(z).astype(o_ref.dtype)


def mlp_forward(x, params, *, tb=512):
    """x: [B, ...] -> flattened to [B, D] (nn.Flatten), then fused batch-tiled MLP kernel."""
    B = x.shape[0]
    x2d = x.reshape(B, -1)
    assert x2d.shape[1] == D, f"expected {D} features after flatten, got {x2d.shape[1]}"
    x2d = x2d.astype(jnp.bfloat16)

    w1, b1, w2, b2, w3, b3 = params

    # Batch tile: multiple of 8 (sublane), capped by tb; pad B so the grid divides evenly.
    tb = _round_up(max(tb, 8), 8)
    tb_eff = min(tb, _round_up(B, 8))
    b_pad = _round_up(B, tb_eff)
    if b_pad != B:
        x2d = jnp.pad(x2d, ((0, b_pad - B), (0, 0)))

    grid = (b_pad // tb_eff,)

    # Weights/biases: full-array blocks with a constant index map -> DMA'd once, VMEM-resident.
    def resident(arr):
        return pl.BlockSpec(arr.shape, lambda i: (0,) * arr.ndim)

    n_weight_bytes = (D * H1 + H1 * H2 + H2 * OUT) * 2 + (H1 + H2 + OUT) * 4
    cost = pl.CostEstimate(
        flops=2 * b_pad * (D * H1 + H1 * H2 + H2 * OUT),
        transcendentals=b_pad * OUT,
        bytes_accessed=b_pad * D * 2 + b_pad * OUT * 4 + n_weight_bytes,
    )

    out = pl.pallas_call(
        _mlp_kernel,
        out_shape=jax.ShapeDtypeStruct((b_pad, OUT), jnp.float32),
        grid=grid,
        in_specs=[
            pl.BlockSpec((tb_eff, D), lambda i: (i, 0)),   # batch-tiled input
            resident(w1), resident(b1),
            resident(w2), resident(b2),
            resident(w3), resident(b3),
        ],
        out_specs=pl.BlockSpec((tb_eff, OUT), lambda i: (i, 0)),
        compiler_params=pltpu.CompilerParams(
            dimension_semantics=("parallel",),             # v7x megacore; no-op on v5e/v6e
        ),
        cost_estimate=cost,
    )(x2d, w1, b1, w2, b2, w3, b3)

    return out[:B] if b_pad != B else out


def init_params(key):
    """torch.nn.Linear-style init (uniform +/- 1/sqrt(fan_in)).
    Weights stored [fan_in, fan_out] in bf16 (MXU-native); biases [1, fan_out] in f32."""
    def linear(key, fan_in, fan_out):
        kw, kb = jax.random.split(key)
        bound = 1.0 / math.sqrt(fan_in)
        w = jax.random.uniform(kw, (fan_in, fan_out), jnp.float32, -bound, bound)
        b = jax.random.uniform(kb, (1, fan_out), jnp.float32, -bound, bound)
        return w.astype(jnp.bfloat16), b

    k1, k2, k3 = jax.random.split(key, 3)
    w1, b1 = linear(k1, D, H1)
    w2, b2 = linear(k2, H1, H2)
    w3, b3 = linear(k3, H2, OUT)
    return (w1, b1, w2, b2, w3, b3)


def mlp_reference(x, params):
    """Pure-JAX reference with the same bf16-operand / f32-accumulate numerics."""
    w1, b1, w2, b2, w3, b3 = params
    x = x.reshape(x.shape[0], -1).astype(jnp.bfloat16)
    h1 = jnp.maximum(jnp.dot(x, w1, preferred_element_type=jnp.float32) + b1, 0.0)
    h2 = jnp.maximum(
        jnp.dot(h1.astype(jnp.bfloat16), w2, preferred_element_type=jnp.float32) + b2, 0.0)
    z = jnp.dot(h2.astype(jnp.bfloat16), w3, preferred_element_type=jnp.float32) + b3
    return jax.nn.sigmoid(z)


if __name__ == "__main__":
    key = jax.random.PRNGKey(0)
    k_x, k_p = jax.random.split(key)
    params = init_params(k_p)

    # Primary small run (Flatten is identity on [B, D]).
    batch = 8
    x = jax.random.normal(k_x, (batch, D), jnp.float32)
    out = jax.block_until_ready(mlp_forward(x, params))
    ref = mlp_reference(x, params)
    assert out.shape == (batch, OUT)
    assert jnp.allclose(out, ref, atol=2e-3, rtol=2e-3), "Pallas output mismatch vs reference"

    # Extra check exercising the multi-step batch grid + padding path (grid=(3,), TB=8).
    batch2 = 20
    x2 = jax.random.normal(k_x, (batch2, D), jnp.float32)
    out2 = jax.block_until_ready(mlp_forward(x2, params, tb=8))
    ref2 = mlp_reference(x2, params)
    assert out2.shape == (batch2, OUT)
    assert jnp.allclose(out2, ref2, atol=2e-3, rtol=2e-3), "Pallas output mismatch (tiled path)"

    print("KERNEL_OK")
</pallas_src>

<mosaic_0001>
module attributes {stable_mosaic.version = 11 : i64} {
  func.func @_mlp_kernel(%arg0: i32, %arg1: memref<8x15xbf16, #tpu.memory_space<vmem>>, %arg2: memref<15x64xbf16, #tpu.memory_space<vmem>>, %arg3: memref<1x64xf32, #tpu.memory_space<vmem>>, %arg4: memref<64x32xbf16, #tpu.memory_space<vmem>>, %arg5: memref<1x32xf32, #tpu.memory_space<vmem>>, %arg6: memref<32x10xbf16, #tpu.memory_space<vmem>>, %arg7: memref<1x10xf32, #tpu.memory_space<vmem>>, %arg8: memref<8x10xf32, #tpu.memory_space<vmem>>) attributes {dimension_semantics = [#tpu.dimension_semantics<parallel>], iteration_bounds = array<i64: 1>, scalar_prefetch = 0 : i64, scratch_operands = 0 : i64, tpu.core_type = #tpu.core_type<tc>, window_params = [{transform_indices = @transform_0, window_bounds = array<i64: 8, 15>}, {pipeline_mode = #tpu.pipeline_mode<synchronous>, transform_indices = @transform_1, window_bounds = array<i64: 15, 64>}, {pipeline_mode = #tpu.pipeline_mode<synchronous>, transform_indices = @transform_2, window_bounds = array<i64: 1, 64>}, {pipeline_mode = #tpu.pipeline_mode<synchronous>, transform_indices = @transform_3, window_bounds = array<i64: 64, 32>}, {pipeline_mode = #tpu.pipeline_mode<synchronous>, transform_indices = @transform_4, window_bounds = array<i64: 1, 32>}, {pipeline_mode = #tpu.pipeline_mode<synchronous>, transform_indices = @transform_5, window_bounds = array<i64: 32, 10>}, {pipeline_mode = #tpu.pipeline_mode<synchronous>, transform_indices = @transform_6, window_bounds = array<i64: 1, 10>}, {transform_indices = @transform_7, window_bounds = array<i64: 8, 10>}]} {
    %c0 = arith.constant 0 : index
    %c0_0 = arith.constant 0 : index
    %0 = vector.load %arg1[%c0, %c0_0] : memref<8x15xbf16, #tpu.memory_space<vmem>>, vector<8x15xbf16>
    %c0_1 = arith.constant 0 : index
    %c0_2 = arith.constant 0 : index
    %1 = vector.load %arg2[%c0_1, %c0_2] : memref<15x64xbf16, #tpu.memory_space<vmem>>, vector<15x64xbf16>
    %cst = arith.constant dense<0.000000e+00> : vector<8x64xf32>
    %2 = tpu.matmul %0, %1, %cst {dimension_numbers = #tpu.dot_dimension_numbers<[1], [0], [0], [1], [0, 0, 1, 1], [], []>} : vector<8x15xbf16>, vector<15x64xbf16>, vector<8x64xf32> -> vector<8x64xf32>
    %c0_3 = arith.constant 0 : index
    %c0_4 = arith.constant 0 : index
    %3 = vector.load %arg3[%c0_3, %c0_4] : memref<1x64xf32, #tpu.memory_space<vmem>>, vector<1x64xf32>
    %4 = vector.broadcast %3 : vector<1x64xf32> to vector<8x64xf32>
    %5 = arith.addf %2, %4 : vector<8x64xf32>
    %cst_5 = arith.constant 0.000000e+00 : f32
    %6 = vector.broadcast %cst_5 : f32 to vector<8x64xf32>
    %7 = arith.maximumf %5, %6 : vector<8x64xf32>
    %8 = arith.truncf %7 : vector<8x64xf32> to vector<8x64xbf16>
    %c0_6 = arith.constant 0 : index
    %c0_7 = arith.constant 0 : index
    %9 = vector.load %arg4[%c0_6, %c0_7] : memref<64x32xbf16, #tpu.memory_space<vmem>>, vector<64x32xbf16>
    %cst_8 = arith.constant dense<0.000000e+00> : vector<8x32xf32>
    %10 = tpu.matmul %8, %9, %cst_8 {dimension_numbers = #tpu.dot_dimension_numbers<[1], [0], [0], [1], [0, 0, 1, 1], [], []>} : vector<8x64xbf16>, vector<64x32xbf16>, vector<8x32xf32> -> vector<8x32xf32>
    %c0_9 = arith.constant 0 : index
    %c0_10 = arith.constant 0 : index
    %11 = vector.load %arg5[%c0_9, %c0_10] : memref<1x32xf32, #tpu.memory_space<vmem>>, vector<1x32xf32>
    %12 = vector.broadcast %11 : vector<1x32xf32> to vector<8x32xf32>
    %13 = arith.addf %10, %12 : vector<8x32xf32>
    %cst_11 = arith.constant 0.000000e+00 : f32
    %14 = vector.broadcast %cst_11 : f32 to vector<8x32xf32>
    %15 = arith.maximumf %13, %14 : vector<8x32xf32>
    %16 = arith.truncf %15 : vector<8x32xf32> to vector<8x32xbf16>
    %c0_12 = arith.constant 0 : index
    %c0_13 = arith.constant 0 : index
    %17 = vector.load %arg6[%c0_12, %c0_13] : memref<32x10xbf16, #tpu.memory_space<vmem>>, vector<32x10xbf16>
    %cst_14 = arith.constant dense<0.000000e+00> : vector<8x10xf32>
    %18 = tpu.matmul %16, %17, %cst_14 {dimension_numbers = #tpu.dot_dimension_numbers<[1], [0], [0], [1], [0, 0, 1, 1], [], []>} : vector<8x32xbf16>, vector<32x10xbf16>, vector<8x10xf32> -> vector<8x10xf32>
    %c0_15 = arith.constant 0 : index
    %c0_16 = arith.constant 0 : index
    %19 = vector.load %arg7[%c0_15, %c0_16] : memref<1x10xf32, #tpu.memory_space<vmem>>, vector<1x10xf32>
    %20 = vector.broadcast %19 : vector<1x10xf32> to vector<8x10xf32>
    %21 = arith.addf %18, %20 : vector<8x10xf32>
    %22 = arith.negf %21 : vector<8x10xf32>
    %23 = math.exp %22 : vector<8x10xf32>
    %cst_17 = arith.constant 1.000000e+00 : f32
    %24 = vector.broadcast %cst_17 : f32 to vector<8x10xf32>
    %25 = arith.addf %24, %23 : vector<8x10xf32>
    %26 = arith.divf %24, %25 : vector<8x10xf32>
    %c0_18 = arith.constant 0 : index
    %c0_19 = arith.constant 0 : index
    %27 = vector.load %arg8[%c0_18, %c0_19] : memref<8x10xf32, #tpu.memory_space<vmem>>, vector<8x10xf32>
    tpu.vector_store %arg8[%c0_18, %c0_19], %26 {strides = array<i32>} : memref<8x10xf32, #tpu.memory_space<vmem>>, vector<8x10xf32>,
    return
  }
  func.func @transform_0(%arg0: i32) -> (i32, i32) {
    %c0_i32 = arith.constant 0 : i32
    %c0_i32_0 = arith.constant 0 : i32
    return %arg0, %c0_i32 : i32, i32
  }
  func.func @transform_1(%arg0: i32) -> (i32, i32) {
    %c0_i32 = arith.constant 0 : i32
    %c0_i32_0 = arith.constant 0 : i32
    %c0_i32_1 = arith.constant 0 : i32
    return %c0_i32, %c0_i32_0 : i32, i32
  }
  func.func @transform_2(%arg0: i32) -> (i32, i32) {
    %c0_i32 = arith.constant 0 : i32
    %c0_i32_0 = arith.constant 0 : i32
    %c0_i32_1 = arith.constant 0 : i32
    return %c0_i32, %c0_i32_0 : i32, i32
  }
  func.func @transform_3(%arg0: i32) -> (i32, i32) {
    %c0_i32 = arith.constant 0 : i32
    %c0_i32_0 = arith.constant 0 : i32
    %c0_i32_1 = arith.constant 0 : i32
    return %c0_i32, %c0_i32_0 : i32, i32
  }
  func.func @transform_4(%arg0: i32) -> (i32, i32) {
    %c0_i32 = arith.constant 0 : i32
    %c0_i32_0 = arith.constant 0 : i32
    %c0_i32_1 = arith.constant 0 : i32
    return %c0_i32, %c0_i32_0 : i32, i32
  }
  func.func @transform_5(%arg0: i32) -> (i32, i32) {
    %c0_i32 = arith.constant 0 : i32
    %c0_i32_0 = arith.constant 0 : i32
    %c0_i32_1 = arith.constant 0 : i32
    return %c0_i32, %c0_i32_0 : i32, i32
  }
  func.func @transform_6(%arg0: i32) -> (i32, i32) {
    %c0_i32 = arith.constant 0 : i32
    %c0_i32_0 = arith.constant 0 : i32
    %c0_i32_1 = arith.constant 0 : i32
    return %c0_i32, %c0_i32_0 : i32, i32
  }
  func.func @transform_7(%arg0: i32) -> (i32, i32) {
    %c0_i32 = arith.constant 0 : i32
    %c0_i32_0 = arith.constant 0 : i32
    return %arg0, %c0_i32 : i32, i32
  }
}

</mosaic_0001>

<bundles_post_ra>
// kernel: tpu_custom_call.1
= control target key start
LH: loop header
LB: loop body
LE: loop exit
PB: predicated region body
PF: predicated region fallthrough
CT: control target
= control target key end

     0   :  { %v359_v1 = vmov 0.0   ;;  %vm47_vm0 = vcmask 1046528   ;;  %vm48_vm1 = vcmask 1047552   ;;  %v360_v2 = vmov 65535   ;;  %s451_s0 = inlined_call_operand.vmem [shape: bf16[8,15], index: 0, kind: input, shape index: {}]   ;;  %s452_s1 = inlined_call_operand.vmem [shape: bf16[15,64], index: 1, kind: input, shape index: {}]   ;;  %s453_s2 = inlined_call_operand.vmem [shape: f32[1,64], index: 2, kind: input, shape index: {}]   ;;  %s454_s3 = inlined_call_operand.vmem [shape: bf16[64,32], index: 3, kind: input, shape index: {}]   ;;  %s455_s4 = inlined_call_operand.vmem [shape: f32[1,32], index: 4, kind: input, shape index: {}]   ;;  %s456_s5 = inlined_call_operand.vmem [shape: bf16[32,10], index: 5, kind: input, shape index: {}]   ;;  %s457_s6 = inlined_call_operand.vmem [shape: f32[1,10], index: 6, kind: input, shape index: {}]   ;;  %s458_s7 = inlined_call_operand.hbm [shape: f32[8,10], index: 7, kind: output, shape index: {}]  }
   0x1   :  { %v324_v0 = vld [vmem:[%s452_s1] sm:$0xff]   ;;  %294 = vmatprep.subr.bf16.mxu0 %v359_v1  ;;  %300 = vmatprep.subr.bf16.mxu1 %v359_v1  ;;  %v49_v3 = vsel %vm47_vm0, 4294967295, %v360_v2  ;;  %vm361_vm2 = vmmov 0   ;;  %vm43_vm3 = vcmask 121856   ;;  %v326_v8 = vld [vmem:[%s454_s3 + $0x8] sm:$0xff]  }
   0x2   :  { %296 = vmatprep.mubr.msk.bf16.mxu0 %vm361_vm2, %v359_v1  ;;  %308 = vmatprep.mubr.msk.bf16.mxu1 %vm361_vm2, %v359_v1  ;;  %v50_v4 = vsel %vm48_vm1, %v49_v3, 0  ;;  %v325_v5 = vld [vmem:[%s454_s3] sm:$0xff]  }
   0x3   :  { %v52_v6 = vand.u32 %v324_v0, %v50_v4  ;;  %v28_v7 = vld [vmem:[%s451_s0] sm:$0xf]  ;;  %301 = vmatpush3.bf16.msra.mxu1 %v325_v5 }
   0x4   :  { %302 = vmatprep.subr.bf16.mxu1 %v359_v1 }
   0x5   :  { %295 = vmatpush3.bf16.msra.mxu0 %v52_v6 }
   0x6   :  { %312 = vmatprep.subr.bf16.mxu0 %v359_v1 }
   0x7   :  { %12 = vsyncpa [#allocation3], 0  ;;  %303 = vmatpush3.bf16.msra.mxu1 %v326_v8  ;;  %v327_v9 = vld [vmem:[%s454_s3 + $0x10] sm:$0xff]   ;;  %v328_v10 = vld [vmem:[%s454_s3 + $0x18] sm:$0xff]   ;;  %vm135_vm4 = vcmask 523264   ;;  %vm204_vm5 = vcmask 261120  }
   0x8   :  { %297 = vmatmul.mubr.msk.bf16.vlgmr.msra.gmra.mrb[0].mxu0 %vm43_vm3, %v28_v7  ;;  %304 = vmatprep.subr.bf16.mxu1 %v359_v1  ;;  %v329_v11 = vld [vmem:[%s456_s5] sm:$0xff]   ;;  %v330_v20 = vld [vmem:[%s456_s5 + $0x8] sm:$0xff]   ;;  %vm254_vm6 = vcmask 80896  }
   0x9   :  { %316 = vmatprep.mubr.msk.bf16.mxu0 %vm361_vm2, %v359_v1  ;;  %313 = vmatpush3.bf16.msra.mxu0 %v329_v11  ;;  %v270_v12 = vld [vmem:[%s453_s2] ss:$0 sm:$0xff] }
   0xa   :  { %314 = vmatprep.subr.bf16.mxu0 %v359_v1  ;;  %v273_v21 = vld [vmem:[%s455_s4] ss:$0 sm:$0xff]  ;;  %s362_s4 = smov [#allocation2]  }
   0xb   :  { %305 = vmatpush3.bf16.msra.mxu1 %v327_v9  ;;  %v279_v29 = vld [vmem:[%s457_s6] ss:$0 sm:$0xff]  ;;  %s262_s5 = sshll.u32 %s362_s4, 4  ;;  %s263_s5 = int_to_ptr.vmem [resolvable:$true] %s262_s5 }
   0xc   :  { %306 = vmatprep.subr.bf16.mxu1 %v359_v1  ;;  %s335_s19 = scalar_lea.vmem %s263_s5, 128  ;;  %p340_p1 = scmp.lt.s32.totalorder %s263_s5, %s263_s5 }
   0xd   :  { %315 = vmatpush3.bf16.msra.mxu0 %v330_v20  ;;  %p336_p0 = scmp.ne.s32.totalorder %s263_s5, %s335_s19  ;;  %p341_p2 = scmp.lt.s32.totalorder %s335_s19, %s335_s19 }
   0xf   :  { %307 = vmatpush3.bf16.msra.mxu1 %v328_v10  ;;  %p342_p3 = por %p341_p2, %p340_p1 }
  0x11   :  { %p343_p4 = pnand %p342_p3, %p336_p0 }
  0xdb   :  { %v88_v13 = vpop.f32.mrb[0].mxu0 }
  0xdc   :  { %v89_v14 = vadd.f32 %v270_v12, %v88_v13  ;;  %v298_v15 = vpop.f32.mrb[1].mxu0 }
  0xdd   :  { %v91_v16 = vpop.f32.mrb[2].mxu0 }
  0xde   :  { %v94_v17 = vmax.f32 %v89_v14, 0.0  ;;  %v299_v18 = vpop.f32.mrb[3].mxu0 }
  0xe0   :  { %v95_v19 = vpack.c.bf16 %v94_v17, %v94_v17 }
  0xe2   :  { %309 = vmatmul.mubr.msk.bf16.vlgmr.msra.gmra.mrb[0].mxu1 %vm135_vm4, %v95_v19 }
 0x1b5   :  { %v173_v22 = vpop.f32.mrb[0].mxu1 }
 0x1b6   :  { %v174_v23 = vadd.f32 %v273_v21, %v173_v22  ;;  %v310_v24 = vpop.f32.mrb[1].mxu1 }
 0x1b7   :  { %v176_v25 = vpop.f32.mrb[2].mxu1 }
 0x1b8   :  { %v179_v26 = vmax.f32 %v174_v23, 0.0  ;;  %v311_v27 = vpop.f32.mrb[3].mxu1 }
 0x1ba   :  { %v180_v28 = vpack.c.bf16 %v179_v26, %v179_v26 }
 0x1bc   :  { %317 = vmatmul.mubr.msk.bf16.vlgmr.msra.gmra.mrb[4].mxu0 %vm204_vm5, %v180_v28 }
 0x28f   :  { %v242_v30 = vpop.f32.mrb[4].mxu0 }
 0x290   :  { %v243_v31 = vadd.f32 %v279_v29, %v242_v30  ;;  %v318_v32 = vpop.f32.mrb[5].mxu0 }
 0x291   :  { %v245_v33 = vpop.f32.mrb[6].mxu0 }
 0x292   :  { %v283_v34 = vmul.f32 -1.442695, %v243_v31  ;;  %v319_v35 = vpop.f32.mrb[7].mxu0 }
 0x294   :  { %331 = vpow2.f32 %v283_v34 }
 0x29e   :  { %v332_v36 = vpop.eup %331 }
 0x29f   :  { %v251_v37 = vadd.f32 1.0, %v332_v36 }
 0x2a1   :  { %333 = vrcp.f32 %v251_v37 }
 0x2ab   :  { %v334_v38 = vpop.eup %333 }
 0x2ac   :  { %255 = vst.msk [vmem:[#allocation2] sm:$0xff] %vm254_vm6, %v334_v38 }
 0x2ad   :  { %346 = shalt.err (!%p343_p4)
}
 0x2ae   :  { %s347_s21 = scalar_lea.hbm %s458_s7, 128 }
 0x2af   :  { %p348_p5 = scmp.ne.s32.totalorder %s458_s7, %s347_s21  ;;  %p351_p6 = scmp.lt.u32.totalorder %s347_s21, %s458_s7 }
 0x2b1   :  { %p353_p7 = pnand %p351_p6, %p348_p5 }
 0x2b3   :  { %356 = shalt.err (!%p353_p7)
}
 0x2b4   :  { %265 = dma.vmem_to_hbm [thread:$0]  %s263_s5, 128, %s458_s7, [#allocation3]  }
 0x2b5   :  { %357 = dma.done.wait [#allocation3], 128  }
 0x2b6   :  { %358 = vsyncadd [#allocation3], 4294967168 }
 0x2b7   :  { %269 = vsyncpa [#allocation3], 1 }

</bundles_post_ra>
